<compile_context>
chip_gen: v5e
topology: v5e:2x2
jax: 0.10.0
libtpu: 0.0.40
codegen_flags: <defaults>
</compile_context>

<pallas_src>
import functools

import jax
import jax.numpy as jnp
from jax import lax
from jax.experimental import pallas as pl
from jax.experimental.pallas import tpu as pltpu

INPUT_DIM = 6
HIDDEN_DIM = 32
FC1_DIM = 16


def concentration_kernel(gx_ref, w_hh_ref, w1_ref, b1_ref, w2_ref, b2_ref,
                         out_ref, h_scr, c_scr, *, seq_len):
    """One (batch-tile, time-tile) grid step of the LSTM recurrence.

    gx_ref : (tT, bb, 4H) bf16   precomputed x@W_ih^T + b_ih + b_hh
    w_hh_ref: (H, 4H)      bf16   pre-transposed recurrent weight
    w1_ref : (H, 16) f32, b1_ref: (1, 16) f32, w2_ref: (16, 1) f32, b2_ref: (1,1) f32
    out_ref: (bb, 1) f32          sigmoid(fc(h_T))
    h_scr/c_scr: (bb, H) f32      state carried across the T grid axis
    """
    t_idx = pl.program_id(1)
    n_t = pl.num_programs(1)
    tT, bb, G = gx_ref.shape
    H = G // 4

    # Fresh h/c at the start of each batch tile's T sweep.
    @pl.when(t_idx == 0)
    def _():
        h_scr[...] = jnp.zeros_like(h_scr)
        c_scr[...] = jnp.zeros_like(c_scr)

    w_hh = w_hh_ref[...]                      # (H, 4H) bf16, resident
    t_base = t_idx * tT

    def step(s, carry):
        h, c = carry                          # f32 state
        # Only the hidden projection sits on the serial chain; input
        # projection + biases were precomputed into gx_ref (stored bf16).
        gx = gx_ref[s].astype(jnp.float32)    # (bb, 4H)
        gh = jnp.dot(h.astype(jnp.bfloat16), w_hh,
                     preferred_element_type=jnp.float32)
        gates = gx + gh                       # (bb, 4H) f32
        # PyTorch gate order i, f, g, o: one full-vreg sigmoid (covers i/f/o),
        # tanh only on the g slice.
        sig = jax.nn.sigmoid(gates)
        i = sig[:, 0:H]
        f = sig[:, H:2 * H]
        o = sig[:, 3 * H:4 * H]
        g = jnp.tanh(gates[:, 2 * H:3 * H])
        c_new = f * c + i * g
        h_new = o * jnp.tanh(c_new)
        # Mask steps past the true sequence length (tail T tile padding).
        valid = (t_base + s) < seq_len
        h = jnp.where(valid, h_new, h)
        c = jnp.where(valid, c_new, c)
        return (h, c)

    unroll = tT if tT <= 8 else 8
    h_fin, c_fin = lax.fori_loop(0, tT, step, (h_scr[...], c_scr[...]),
                                 unroll=unroll)
    h_scr[...] = h_fin
    c_scr[...] = c_fin

    # fc: Linear(H, 16) -> ReLU -> Linear(16, 1) -> Sigmoid, only after the
    # last time tile of this batch tile.
    @pl.when(t_idx == n_t - 1)
    def _():
        z1 = jnp.dot(h_fin, w1_ref[...],
                     preferred_element_type=jnp.float32) + b1_ref[...]
        z1 = jnp.maximum(z1, 0.0)
        z2 = jnp.dot(z1, w2_ref[...],
                     preferred_element_type=jnp.float32) + b2_ref[...]
        out_ref[...] = jax.nn.sigmoid(z2)     # (bb, 1)


def init_params(key, input_dim=INPUT_DIM, hidden_dim=HIDDEN_DIM):
    # Deterministic synthetic init, PyTorch-style uniform(-1/sqrt(fan_in), ...).
    ks = jax.random.split(key, 8)
    u = lambda k, shape, b: jax.random.uniform(k, shape, jnp.float32, -b, b)
    bnd = 1.0 / jnp.sqrt(hidden_dim)    # LSTM params
    bnd1 = 1.0 / jnp.sqrt(hidden_dim)   # fan_in of fc1 = hidden_dim
    bnd2 = 1.0 / jnp.sqrt(FC1_DIM)      # fan_in of fc2 = 16
    return {
        "w_ih": u(ks[0], (4 * hidden_dim, input_dim), bnd),
        "w_hh": u(ks[1], (4 * hidden_dim, hidden_dim), bnd),
        "b_ih": u(ks[2], (1, 4 * hidden_dim), bnd),
        "b_hh": u(ks[3], (1, 4 * hidden_dim), bnd),
        "w1":   u(ks[4], (FC1_DIM, hidden_dim), bnd1),
        "b1":   u(ks[5], (1, FC1_DIM), bnd1),
        "w2":   u(ks[6], (1, FC1_DIM), bnd2),
        "b2":   u(ks[7], (1, 1), bnd2),
    }


def concentration_predictor(x, params, *, block_b=512, block_t=32):
    """x: (B, T, D) or (B, D); returns (B,) float32 — matches the PyTorch module."""
    if x.ndim == 2:
        x = x[:, None, :]                              # unsqueeze(1)
    x = x.astype(jnp.float32)
    B, T, D = x.shape
    H = params["w_hh"].shape[1]
    G = 4 * H

    # Hoisted input projection + fused biases: one batched matmul, done once,
    # outside the serial recurrence.  Stored bf16 (dominant HBM operand),
    # lane-dense (T, B, 4H).
    x_tm = jnp.transpose(x, (1, 0, 2))                 # (T, B, D) time-major
    bias = params["b_ih"] + params["b_hh"]             # (1, 4H)
    gates_x = (jnp.einsum("tbd,gd->tbg", x_tm, params["w_ih"]) + bias
               ).astype(jnp.bfloat16)

    # Pre-transposed, lane-dense weights for the kernel.
    w_hh_t = params["w_hh"].T.astype(jnp.bfloat16)     # (H, 4H) bf16 (MXU operand)
    w1_t = params["w1"].T                              # (H, 16) f32 (runs once)
    w2_t = params["w2"].T                              # (16, 1) f32
    b1 = params["b1"]                                  # (1, 16)
    b2 = params["b2"]                                  # (1, 1)

    # Batch tile: amortize the serial T-step chain over up to 512 rows.
    bb = B if B <= block_b else block_b
    # Time tile: fixed VMEM footprint independent of T; keep the
    # double-buffered gx slab <= ~16 MiB (v7x 64 MiB VMEM safe).
    tT = T if T <= block_t else block_t
    while tT > 8 and 2 * tT * bb * G * 2 > (16 << 20):
        tT //= 2
    nb = pl.cdiv(B, bb)
    nt = pl.cdiv(T, tT)

    kernel = functools.partial(concentration_kernel, seq_len=T)

    # Explicit VMEM budget (double-buffered gx + weights + out + h/c scratch).
    vmem_bytes = (2 * tT * bb * G * 2                       # gx (bf16) x2 bufs
                  + 2 * H * G * 2                           # w_hh (bf16)
                  + 2 * (H * FC1_DIM + 2 * FC1_DIM + 1) * 4 # fc weights/biases
                  + 2 * bb * 4                              # out block
                  + 2 * bb * H * 4)                         # h/c scratch
    vmem_limit = min(max(2 * vmem_bytes + (4 << 20), 8 << 20), 48 << 20)

    out = pl.pallas_call(
        kernel,
        out_shape=jax.ShapeDtypeStruct((B, 1), jnp.float32),
        grid_spec=pltpu.PrefetchScalarGridSpec(
            num_scalar_prefetch=0,
            grid=(nb, nt),
            in_specs=[
                pl.BlockSpec((tT, bb, G), lambda b, t: (t, b, 0)),
                pl.BlockSpec((H, G), lambda b, t: (0, 0)),
                pl.BlockSpec((H, FC1_DIM), lambda b, t: (0, 0)),
                pl.BlockSpec((1, FC1_DIM), lambda b, t: (0, 0)),
                pl.BlockSpec((FC1_DIM, 1), lambda b, t: (0, 0)),
                pl.BlockSpec((1, 1), lambda b, t: (0, 0)),
            ],
            out_specs=pl.BlockSpec((bb, 1), lambda b, t: (b, 0)),
            scratch_shapes=[pltpu.VMEM((bb, H), jnp.float32),
                            pltpu.VMEM((bb, H), jnp.float32)],
        ),
        compiler_params=pltpu.CompilerParams(
            dimension_semantics=("parallel", "arbitrary"),
            vmem_limit_bytes=int(vmem_limit)),
    )(gates_x, w_hh_t, w1_t, b1, w2_t, b2)
    return out[:, 0]                                   # squeeze(-1)


def concentration_reference(x, params):
    """Pure-JAX f32 reference matching the PyTorch module."""
    if x.ndim == 2:
        x = x[:, None, :]
    x = x.astype(jnp.float32)
    B, T, D = x.shape
    H = params["w_hh"].shape[1]

    def step(carry, xt):
        h, c = carry
        gates = (xt @ params["w_ih"].T + params["b_ih"]
                 + h @ params["w_hh"].T + params["b_hh"])
        i, f, g, o = jnp.split(gates, 4, axis=-1)
        i, f, o = jax.nn.sigmoid(i), jax.nn.sigmoid(f), jax.nn.sigmoid(o)
        g = jnp.tanh(g)
        c = f * c + i * g
        h = o * jnp.tanh(c)
        return (h, c), None

    h0 = jnp.zeros((B, H), jnp.float32)
    c0 = jnp.zeros((B, H), jnp.float32)
    (h, _), _ = lax.scan(step, (h0, c0), jnp.transpose(x, (1, 0, 2)))
    z1 = jnp.maximum(h @ params["w1"].T + params["b1"], 0.0)
    z2 = z1 @ params["w2"].T + params["b2"]
    return jax.nn.sigmoid(z2)[:, 0]


if __name__ == "__main__":
    key = jax.random.PRNGKey(0)
    k_param, k_x = jax.random.split(key)
    params = init_params(k_param)

    # Small shapes consistent with the module (B=8, T=8, D=6, H=32).
    B, T, D = 8, 8, INPUT_DIM
    x = jax.random.normal(k_x, (B, T, D), jnp.float32)

    predict = jax.jit(concentration_predictor)
    y = predict(x, params)
    jax.block_until_ready(y)
    assert y.shape == (B,), y.shape
    assert bool(jnp.all(jnp.isfinite(y)))
    assert bool(jnp.all((y >= 0.0) & (y <= 1.0)))
    y_ref = concentration_reference(x, params)
    assert float(jnp.max(jnp.abs(y - y_ref))) < 5e-2  # bf16 storage tolerance

    # 2-D input path (x.dim() == 2 branch of the module).
    x2 = jax.random.normal(k_x, (B, D), jnp.float32)
    y2 = predict(x2, params)
    jax.block_until_ready(y2)
    assert y2.shape == (B,), y2.shape
    assert float(jnp.max(jnp.abs(y2 - concentration_reference(x2, params)))) < 5e-2

    # Exercise the multi-tile grid path (nb=2 batch tiles, nt=3 time tiles with
    # a masked tail) at small shapes.
    predict_tiled = jax.jit(functools.partial(
        concentration_predictor, block_b=8, block_t=4))
    x3 = jax.random.normal(jax.random.PRNGKey(1), (16, 10, D), jnp.float32)
    y3 = predict_tiled(x3, params)
    jax.block_until_ready(y3)
    assert y3.shape == (16,), y3.shape
    assert float(jnp.max(jnp.abs(y3 - concentration_reference(x3, params)))) < 5e-2

    print("KERNEL_OK")
</pallas_src>

<mosaic_0001>
module attributes {stable_mosaic.version = 11 : i64} {
  func.func @concentration_kernel(%arg0: i32, %arg1: i32, %arg2: memref<8x8x128xbf16, #tpu.memory_space<vmem>>, %arg3: memref<32x128xbf16, #tpu.memory_space<vmem>>, %arg4: memref<32x16xf32, #tpu.memory_space<vmem>>, %arg5: memref<1x16xf32, #tpu.memory_space<vmem>>, %arg6: memref<16x1xf32, #tpu.memory_space<vmem>>, %arg7: memref<1x1xf32, #tpu.memory_space<vmem>>, %arg8: memref<8x1xf32, #tpu.memory_space<vmem>>, %arg9: memref<8x32xf32, #tpu.memory_space<vmem>>, %arg10: memref<8x32xf32, #tpu.memory_space<vmem>>) attributes {dimension_semantics = [#tpu.dimension_semantics<parallel>, #tpu.dimension_semantics<arbitrary>], iteration_bounds = array<i64: 1, 1>, scalar_prefetch = 0 : i64, scratch_operands = 2 : i64, tpu.core_type = #tpu.core_type<tc>, window_params = [{transform_indices = @transform_0, window_bounds = array<i64: 8, 8, 128>}, {pipeline_mode = #tpu.pipeline_mode<synchronous>, transform_indices = @transform_1, window_bounds = array<i64: 32, 128>}, {pipeline_mode = #tpu.pipeline_mode<synchronous>, transform_indices = @transform_2, window_bounds = array<i64: 32, 16>}, {pipeline_mode = #tpu.pipeline_mode<synchronous>, transform_indices = @transform_3, window_bounds = array<i64: 1, 16>}, {pipeline_mode = #tpu.pipeline_mode<synchronous>, transform_indices = @transform_4, window_bounds = array<i64: 16, 1>}, {pipeline_mode = #tpu.pipeline_mode<synchronous>, transform_indices = @transform_5, window_bounds = array<i64: 1, 1>}, {transform_indices = @transform_6, window_bounds = array<i64: 8, 1>}]} {
    %c0_i32 = arith.constant 0 : i32
    %0 = arith.cmpi eq, %arg1, %c0_i32 : i32
    %1 = arith.extui %0 : i1 to i32
    %c0_i32_0 = arith.constant 0 : i32
    %2 = arith.cmpi ne, %1, %c0_i32_0 : i32
    scf.if %2 {
      %cst_53 = arith.constant 0.000000e+00 : f32
      %220 = vector.broadcast %cst_53 : f32 to vector<8x32xf32>
      %c0_54 = arith.constant 0 : index
      %c0_55 = arith.constant 0 : index
      %221 = vector.load %arg9[%c0_54, %c0_55] : memref<8x32xf32, #tpu.memory_space<vmem>>, vector<8x32xf32>
      tpu.vector_store %arg9[%c0_54, %c0_55], %220 {strides = array<i32>} : memref<8x32xf32, #tpu.memory_space<vmem>>, vector<8x32xf32>,
      %cst_56 = arith.constant 0.000000e+00 : f32
      %222 = vector.broadcast %cst_56 : f32 to vector<8x32xf32>
      %c0_57 = arith.constant 0 : index
      %c0_58 = arith.constant 0 : index
      %223 = vector.load %arg10[%c0_57, %c0_58] : memref<8x32xf32, #tpu.memory_space<vmem>>, vector<8x32xf32>
      tpu.vector_store %arg10[%c0_57, %c0_58], %222 {strides = array<i32>} : memref<8x32xf32, #tpu.memory_space<vmem>>, vector<8x32xf32>,
    } else {
    }
    %c0 = arith.constant 0 : index
    %c0_1 = arith.constant 0 : index
    %3 = vector.load %arg3[%c0, %c0_1] : memref<32x128xbf16, #tpu.memory_space<vmem>>, vector<32x128xbf16>
    %c8_i32 = arith.constant 8 : i32
    %4 = arith.muli %arg1, %c8_i32 : i32
    %c0_2 = arith.constant 0 : index
    %c0_3 = arith.constant 0 : index
    %5 = vector.load %arg9[%c0_2, %c0_3] : memref<8x32xf32, #tpu.memory_space<vmem>>, vector<8x32xf32>
    %c0_4 = arith.constant 0 : index
    %c0_5 = arith.constant 0 : index
    %6 = vector.load %arg10[%c0_4, %c0_5] : memref<8x32xf32, #tpu.memory_space<vmem>>, vector<8x32xf32>
    %c0_i32_6 = arith.constant 0 : i32
    %7 = arith.index_cast %c0_i32_6 : i32 to index
    %c0_7 = arith.constant 0 : index
    %c0_8 = arith.constant 0 : index
    %8 = vector.load %arg2[%7, %c0_7, %c0_8] : memref<8x8x128xbf16, #tpu.memory_space<vmem>>, vector<1x8x128xbf16>
    %9 = vector.shape_cast %8 : vector<1x8x128xbf16> to vector<8x128xbf16>
    %10 = arith.extf %9 : vector<8x128xbf16> to vector<8x128xf32>
    %11 = arith.truncf %5 : vector<8x32xf32> to vector<8x32xbf16>
    %cst = arith.constant dense<0.000000e+00> : vector<8x128xf32>
    %12 = tpu.matmul %11, %3, %cst {dimension_numbers = #tpu.dot_dimension_numbers<[1], [0], [0], [1], [0, 0, 1, 1], [], []>} : vector<8x32xbf16>, vector<32x128xbf16>, vector<8x128xf32> -> vector<8x128xf32>
    %13 = arith.addf %10, %12 : vector<8x128xf32>
    %14 = arith.negf %13 : vector<8x128xf32>
    %15 = math.exp %14 : vector<8x128xf32>
    %cst_9 = arith.constant 1.000000e+00 : f32
    %16 = vector.broadcast %cst_9 : f32 to vector<8x128xf32>
    %17 = arith.addf %16, %15 : vector<8x128xf32>
    %18 = arith.divf %16, %17 : vector<8x128xf32>
    %19 = vector.extract_strided_slice %18 {offsets = [0, 0], sizes = [8, 32], strides = [1, 1]} : vector<8x128xf32> to vector<8x32xf32>
    %20 = vector.extract_strided_slice %18 {offsets = [0, 32], sizes = [8, 32], strides = [1, 1]} : vector<8x128xf32> to vector<8x32xf32>
    %21 = vector.extract_strided_slice %18 {offsets = [0, 96], sizes = [8, 32], strides = [1, 1]} : vector<8x128xf32> to vector<8x32xf32>
    %22 = vector.extract_strided_slice %13 {offsets = [0, 64], sizes = [8, 32], strides = [1, 1]} : vector<8x128xf32> to vector<8x32xf32>
    %23 = math.tanh %22 : vector<8x32xf32>
    %24 = arith.mulf %20, %6 : vector<8x32xf32>
    %25 = arith.mulf %19, %23 : vector<8x32xf32>
    %26 = arith.addf %24, %25 : vector<8x32xf32>
    %27 = math.tanh %26 : vector<8x32xf32>
    %28 = arith.mulf %21, %27 : vector<8x32xf32>
    %29 = arith.addi %4, %c0_i32_6 : i32
    %c8_i32_10 = arith.constant 8 : i32
    %30 = arith.cmpi slt, %29, %c8_i32_10 : i32
    %31 = arith.select %30, %28, %5 : vector<8x32xf32>
    %32 = arith.select %30, %26, %6 : vector<8x32xf32>
    %c1_i32 = arith.constant 1 : i32
    %33 = arith.index_cast %c1_i32 : i32 to index
    %c0_11 = arith.constant 0 : index
    %c0_12 = arith.constant 0 : index
    %34 = vector.load %arg2[%33, %c0_11, %c0_12] : memref<8x8x128xbf16, #tpu.memory_space<vmem>>, vector<1x8x128xbf16>
    %35 = vector.shape_cast %34 : vector<1x8x128xbf16> to vector<8x128xbf16>
    %36 = arith.extf %35 : vector<8x128xbf16> to vector<8x128xf32>
    %37 = arith.truncf %31 : vector<8x32xf32> to vector<8x32xbf16>
    %cst_13 = arith.constant dense<0.000000e+00> : vector<8x128xf32>
    %38 = tpu.matmul %37, %3, %cst_13 {dimension_numbers = #tpu.dot_dimension_numbers<[1], [0], [0], [1], [0, 0, 1, 1], [], []>} : vector<8x32xbf16>, vector<32x128xbf16>, vector<8x128xf32> -> vector<8x128xf32>
    %39 = arith.addf %36, %38 : vector<8x128xf32>
    %40 = arith.negf %39 : vector<8x128xf32>
    %41 = math.exp %40 : vector<8x128xf32>
    %cst_14 = arith.constant 1.000000e+00 : f32
    %42 = vector.broadcast %cst_14 : f32 to vector<8x128xf32>
    %43 = arith.addf %42, %41 : vector<8x128xf32>
    %44 = arith.divf %42, %43 : vector<8x128xf32>
    %45 = vector.extract_strided_slice %44 {offsets = [0, 0], sizes = [8, 32], strides = [1, 1]} : vector<8x128xf32> to vector<8x32xf32>
    %46 = vector.extract_strided_slice %44 {offsets = [0, 32], sizes = [8, 32], strides = [1, 1]} : vector<8x128xf32> to vector<8x32xf32>
    %47 = vector.extract_strided_slice %44 {offsets = [0, 96], sizes = [8, 32], strides = [1, 1]} : vector<8x128xf32> to vector<8x32xf32>
    %48 = vector.extract_strided_slice %39 {offsets = [0, 64], sizes = [8, 32], strides = [1, 1]} : vector<8x128xf32> to vector<8x32xf32>
    %49 = math.tanh %48 : vector<8x32xf32>
    %50 = arith.mulf %46, %32 : vector<8x32xf32>
    %51 = arith.mulf %45, %49 : vector<8x32xf32>
    %52 = arith.addf %50, %51 : vector<8x32xf32>
    %53 = math.tanh %52 : vector<8x32xf32>
    %54 = arith.mulf %47, %53 : vector<8x32xf32>
    %55 = arith.addi %4, %c1_i32 : i32
    %c8_i32_15 = arith.constant 8 : i32
    %56 = arith.cmpi slt, %55, %c8_i32_15 : i32
    %57 = arith.select %56, %54, %31 : vector<8x32xf32>
    %58 = arith.select %56, %52, %32 : vector<8x32xf32>
    %c2_i32 = arith.constant 2 : i32
    %59 = arith.index_cast %c2_i32 : i32 to index
    %c0_16 = arith.constant 0 : index
    %c0_17 = arith.constant 0 : index
    %60 = vector.load %arg2[%59, %c0_16, %c0_17] : memref<8x8x128xbf16, #tpu.memory_space<vmem>>, vector<1x8x128xbf16>
    %61 = vector.shape_cast %60 : vector<1x8x128xbf16> to vector<8x128xbf16>
    %62 = arith.extf %61 : vector<8x128xbf16> to vector<8x128xf32>
    %63 = arith.truncf %57 : vector<8x32xf32> to vector<8x32xbf16>
    %cst_18 = arith.constant dense<0.000000e+00> : vector<8x128xf32>
    %64 = tpu.matmul %63, %3, %cst_18 {dimension_numbers = #tpu.dot_dimension_numbers<[1], [0], [0], [1], [0, 0, 1, 1], [], []>} : vector<8x32xbf16>, vector<32x128xbf16>, vector<8x128xf32> -> vector<8x128xf32>
    %65 = arith.addf %62, %64 : vector<8x128xf32>
    %66 = arith.negf %65 : vector<8x128xf32>
    %67 = math.exp %66 : vector<8x128xf32>
    %cst_19 = arith.constant 1.000000e+00 : f32
    %68 = vector.broadcast %cst_19 : f32 to vector<8x128xf32>
    %69 = arith.addf %68, %67 : vector<8x128xf32>
    %70 = arith.divf %68, %69 : vector<8x128xf32>
    %71 = vector.extract_strided_slice %70 {offsets = [0, 0], sizes = [8, 32], strides = [1, 1]} : vector<8x128xf32> to vector<8x32xf32>
    %72 = vector.extract_strided_slice %70 {offsets = [0, 32], sizes = [8, 32], strides = [1, 1]} : vector<8x128xf32> to vector<8x32xf32>
    %73 = vector.extract_strided_slice %70 {offsets = [0, 96], sizes = [8, 32], strides = [1, 1]} : vector<8x128xf32> to vector<8x32xf32>
    %74 = vector.extract_strided_slice %65 {offsets = [0, 64], sizes = [8, 32], strides = [1, 1]} : vector<8x128xf32> to vector<8x32xf32>
    %75 = math.tanh %74 : vector<8x32xf32>
    %76 = arith.mulf %72, %58 : vector<8x32xf32>
    %77 = arith.mulf %71, %75 : vector<8x32xf32>
    %78 = arith.addf %76, %77 : vector<8x32xf32>
    %79 = math.tanh %78 : vector<8x32xf32>
    %80 = arith.mulf %73, %79 : vector<8x32xf32>
    %81 = arith.addi %4, %c2_i32 : i32
    %c8_i32_20 = arith.constant 8 : i32
    %82 = arith.cmpi slt, %81, %c8_i32_20 : i32
    %83 = arith.select %82, %80, %57 : vector<8x32xf32>
    %84 = arith.select %82, %78, %58 : vector<8x32xf32>
    %c3_i32 = arith.constant 3 : i32
    %85 = arith.index_cast %c3_i32 : i32 to index
    %c0_21 = arith.constant 0 : index
    %c0_22 = arith.constant 0 : index
    %86 = vector.load %arg2[%85, %c0_21, %c0_22] : memref<8x8x128xbf16, #tpu.memory_space<vmem>>, vector<1x8x128xbf16>
    %87 = vector.shape_cast %86 : vector<1x8x128xbf16> to vector<8x128xbf16>
    %88 = arith.extf %87 : vector<8x128xbf16> to vector<8x128xf32>
    %89 = arith.truncf %83 : vector<8x32xf32> to vector<8x32xbf16>
    %cst_23 = arith.constant dense<0.000000e+00> : vector<8x128xf32>
    %90 = tpu.matmul %89, %3, %cst_23 {dimension_numbers = #tpu.dot_dimension_numbers<[1], [0], [0], [1], [0, 0, 1, 1], [], []>} : vector<8x32xbf16>, vector<32x128xbf16>, vector<8x128xf32> -> vector<8x128xf32>
    %91 = arith.addf %88, %90 : vector<8x128xf32>
    %92 = arith.negf %91 : vector<8x128xf32>
    %93 = math.exp %92 : vector<8x128xf32>
    %cst_24 = arith.constant 1.000000e+00 : f32
    %94 = vector.broadcast %cst_24 : f32 to vector<8x128xf32>
    %95 = arith.addf %94, %93 : vector<8x128xf32>
    %96 = arith.divf %94, %95 : vector<8x128xf32>
    %97 = vector.extract_strided_slice %96 {offsets = [0, 0], sizes = [8, 32], strides = [1, 1]} : vector<8x128xf32> to vector<8x32xf32>
    %98 = vector.extract_strided_slice %96 {offsets = [0, 32], sizes = [8, 32], strides = [1, 1]} : vector<8x128xf32> to vector<8x32xf32>
    %99 = vector.extract_strided_slice %96 {offsets = [0, 96], sizes = [8, 32], strides = [1, 1]} : vector<8x128xf32> to vector<8x32xf32>
    %100 = vector.extract_strided_slice %91 {offsets = [0, 64], sizes = [8, 32], strides = [1, 1]} : vector<8x128xf32> to vector<8x32xf32>
    %101 = math.tanh %100 : vector<8x32xf32>
    %102 = arith.mulf %98, %84 : vector<8x32xf32>
    %103 = arith.mulf %97, %101 : vector<8x32xf32>
    %104 = arith.addf %102, %103 : vector<8x32xf32>
    %105 = math.tanh %104 : vector<8x32xf32>
    %106 = arith.mulf %99, %105 : vector<8x32xf32>
    %107 = arith.addi %4, %c3_i32 : i32
    %c8_i32_25 = arith.constant 8 : i32
    %108 = arith.cmpi slt, %107, %c8_i32_25 : i32
    %109 = arith.select %108, %106, %83 : vector<8x32xf32>
    %110 = arith.select %108, %104, %84 : vector<8x32xf32>
    %c4_i32 = arith.constant 4 : i32
    %111 = arith.index_cast %c4_i32 : i32 to index
    %c0_26 = arith.constant 0 : index
    %c0_27 = arith.constant 0 : index
    %112 = vector.load %arg2[%111, %c0_26, %c0_27] : memref<8x8x128xbf16, #tpu.memory_space<vmem>>, vector<1x8x128xbf16>
    %113 = vector.shape_cast %112 : vector<1x8x128xbf16> to vector<8x128xbf16>
    %114 = arith.extf %113 : vector<8x128xbf16> to vector<8x128xf32>
    %115 = arith.truncf %109 : vector<8x32xf32> to vector<8x32xbf16>
    %cst_28 = arith.constant dense<0.000000e+00> : vector<8x128xf32>
    %116 = tpu.matmul %115, %3, %cst_28 {dimension_numbers = #tpu.dot_dimension_numbers<[1], [0], [0], [1], [0, 0, 1, 1], [], []>} : vector<8x32xbf16>, vector<32x128xbf16>, vector<8x128xf32> -> vector<8x128xf32>
    %117 = arith.addf %114, %116 : vector<8x128xf32>
    %118 = arith.negf %117 : vector<8x128xf32>
    %119 = math.exp %118 : vector<8x128xf32>
    %cst_29 = arith.constant 1.000000e+00 : f32
    %120 = vector.broadcast %cst_29 : f32 to vector<8x128xf32>
    %121 = arith.addf %120, %119 : vector<8x128xf32>
    %122 = arith.divf %120, %121 : vector<8x128xf32>
    %123 = vector.extract_strided_slice %122 {offsets = [0, 0], sizes = [8, 32], strides = [1, 1]} : vector<8x128xf32> to vector<8x32xf32>
    %124 = vector.extract_strided_slice %122 {offsets = [0, 32], sizes = [8, 32], strides = [1, 1]} : vector<8x128xf32> to vector<8x32xf32>
    %125 = vector.extract_strided_slice %122 {offsets = [0, 96], sizes = [8, 32], strides = [1, 1]} : vector<8x128xf32> to vector<8x32xf32>
    %126 = vector.extract_strided_slice %117 {offsets = [0, 64], sizes = [8, 32], strides = [1, 1]} : vector<8x128xf32> to vector<8x32xf32>
    %127 = math.tanh %126 : vector<8x32xf32>
    %128 = arith.mulf %124, %110 : vector<8x32xf32>
    %129 = arith.mulf %123, %127 : vector<8x32xf32>
    %130 = arith.addf %128, %129 : vector<8x32xf32>
    %131 = math.tanh %130 : vector<8x32xf32>
    %132 = arith.mulf %125, %131 : vector<8x32xf32>
    %133 = arith.addi %4, %c4_i32 : i32
    %c8_i32_30 = arith.constant 8 : i32
    %134 = arith.cmpi slt, %133, %c8_i32_30 : i32
    %135 = arith.select %134, %132, %109 : vector<8x32xf32>
    %136 = arith.select %134, %130, %110 : vector<8x32xf32>
    %c5_i32 = arith.constant 5 : i32
    %137 = arith.index_cast %c5_i32 : i32 to index
    %c0_31 = arith.constant 0 : index
    %c0_32 = arith.constant 0 : index
    %138 = vector.load %arg2[%137, %c0_31, %c0_32] : memref<8x8x128xbf16, #tpu.memory_space<vmem>>, vector<1x8x128xbf16>
    %139 = vector.shape_cast %138 : vector<1x8x128xbf16> to vector<8x128xbf16>
    %140 = arith.extf %139 : vector<8x128xbf16> to vector<8x128xf32>
    %141 = arith.truncf %135 : vector<8x32xf32> to vector<8x32xbf16>
    %cst_33 = arith.constant dense<0.000000e+00> : vector<8x128xf32>
    %142 = tpu.matmul %141, %3, %cst_33 {dimension_numbers = #tpu.dot_dimension_numbers<[1], [0], [0], [1], [0, 0, 1, 1], [], []>} : vector<8x32xbf16>, vector<32x128xbf16>, vector<8x128xf32> -> vector<8x128xf32>
    %143 = arith.addf %140, %142 : vector<8x128xf32>
    %144 = arith.negf %143 : vector<8x128xf32>
    %145 = math.exp %144 : vector<8x128xf32>
    %cst_34 = arith.constant 1.000000e+00 : f32
    %146 = vector.broadcast %cst_34 : f32 to vector<8x128xf32>
    %147 = arith.addf %146, %145 : vector<8x128xf32>
    %148 = arith.divf %146, %147 : vector<8x128xf32>
    %149 = vector.extract_strided_slice %148 {offsets = [0, 0], sizes = [8, 32], strides = [1, 1]} : vector<8x128xf32> to vector<8x32xf32>
    %150 = vector.extract_strided_slice %148 {offsets = [0, 32], sizes = [8, 32], strides = [1, 1]} : vector<8x128xf32> to vector<8x32xf32>
    %151 = vector.extract_strided_slice %148 {offsets = [0, 96], sizes = [8, 32], strides = [1, 1]} : vector<8x128xf32> to vector<8x32xf32>
    %152 = vector.extract_strided_slice %143 {offsets = [0, 64], sizes = [8, 32], strides = [1, 1]} : vector<8x128xf32> to vector<8x32xf32>
    %153 = math.tanh %152 : vector<8x32xf32>
    %154 = arith.mulf %150, %136 : vector<8x32xf32>
    %155 = arith.mulf %149, %153 : vector<8x32xf32>
    %156 = arith.addf %154, %155 : vector<8x32xf32>
    %157 = math.tanh %156 : vector<8x32xf32>
    %158 = arith.mulf %151, %157 : vector<8x32xf32>
    %159 = arith.addi %4, %c5_i32 : i32
    %c8_i32_35 = arith.constant 8 : i32
    %160 = arith.cmpi slt, %159, %c8_i32_35 : i32
    %161 = arith.select %160, %158, %135 : vector<8x32xf32>
    %162 = arith.select %160, %156, %136 : vector<8x32xf32>
    %c6_i32 = arith.constant 6 : i32
    %163 = arith.index_cast %c6_i32 : i32 to index
    %c0_36 = arith.constant 0 : index
    %c0_37 = arith.constant 0 : index
    %164 = vector.load %arg2[%163, %c0_36, %c0_37] : memref<8x8x128xbf16, #tpu.memory_space<vmem>>, vector<1x8x128xbf16>
    %165 = vector.shape_cast %164 : vector<1x8x128xbf16> to vector<8x128xbf16>
    %166 = arith.extf %165 : vector<8x128xbf16> to vector<8x128xf32>
    %167 = arith.truncf %161 : vector<8x32xf32> to vector<8x32xbf16>
    %cst_38 = arith.constant dense<0.000000e+00> : vector<8x128xf32>
    %168 = tpu.matmul %167, %3, %cst_38 {dimension_numbers = #tpu.dot_dimension_numbers<[1], [0], [0], [1], [0, 0, 1, 1], [], []>} : vector<8x32xbf16>, vector<32x128xbf16>, vector<8x128xf32> -> vector<8x128xf32>
    %169 = arith.addf %166, %168 : vector<8x128xf32>
    %170 = arith.negf %169 : vector<8x128xf32>
    %171 = math.exp %170 : vector<8x128xf32>
    %cst_39 = arith.constant 1.000000e+00 : f32
    %172 = vector.broadcast %cst_39 : f32 to vector<8x128xf32>
    %173 = arith.addf %172, %171 : vector<8x128xf32>
    %174 = arith.divf %172, %173 : vector<8x128xf32>
    %175 = vector.extract_strided_slice %174 {offsets = [0, 0], sizes = [8, 32], strides = [1, 1]} : vector<8x128xf32> to vector<8x32xf32>
    %176 = vector.extract_strided_slice %174 {offsets = [0, 32], sizes = [8, 32], strides = [1, 1]} : vector<8x128xf32> to vector<8x32xf32>
    %177 = vector.extract_strided_slice %174 {offsets = [0, 96], sizes = [8, 32], strides = [1, 1]} : vector<8x128xf32> to vector<8x32xf32>
    %178 = vector.extract_strided_slice %169 {offsets = [0, 64], sizes = [8, 32], strides = [1, 1]} : vector<8x128xf32> to vector<8x32xf32>
    %179 = math.tanh %178 : vector<8x32xf32>
    %180 = arith.mulf %176, %162 : vector<8x32xf32>
    %181 = arith.mulf %175, %179 : vector<8x32xf32>
    %182 = arith.addf %180, %181 : vector<8x32xf32>
    %183 = math.tanh %182 : vector<8x32xf32>
    %184 = arith.mulf %177, %183 : vector<8x32xf32>
    %185 = arith.addi %4, %c6_i32 : i32
    %c8_i32_40 = arith.constant 8 : i32
    %186 = arith.cmpi slt, %185, %c8_i32_40 : i32
    %187 = arith.select %186, %184, %161 : vector<8x32xf32>
    %188 = arith.select %186, %182, %162 : vector<8x32xf32>
    %c7_i32 = arith.constant 7 : i32
    %189 = arith.index_cast %c7_i32 : i32 to index
    %c0_41 = arith.constant 0 : index
    %c0_42 = arith.constant 0 : index
    %190 = vector.load %arg2[%189, %c0_41, %c0_42] : memref<8x8x128xbf16, #tpu.memory_space<vmem>>, vector<1x8x128xbf16>
    %191 = vector.shape_cast %190 : vector<1x8x128xbf16> to vector<8x128xbf16>
    %192 = arith.extf %191 : vector<8x128xbf16> to vector<8x128xf32>
    %193 = arith.truncf %187 : vector<8x32xf32> to vector<8x32xbf16>
    %cst_43 = arith.constant dense<0.000000e+00> : vector<8x128xf32>
    %194 = tpu.matmul %193, %3, %cst_43 {dimension_numbers = #tpu.dot_dimension_numbers<[1], [0], [0], [1], [0, 0, 1, 1], [], []>} : vector<8x32xbf16>, vector<32x128xbf16>, vector<8x128xf32> -> vector<8x128xf32>
    %195 = arith.addf %192, %194 : vector<8x128xf32>
    %196 = arith.negf %195 : vector<8x128xf32>
    %197 = math.exp %196 : vector<8x128xf32>
    %cst_44 = arith.constant 1.000000e+00 : f32
    %198 = vector.broadcast %cst_44 : f32 to vector<8x128xf32>
    %199 = arith.addf %198, %197 : vector<8x128xf32>
    %200 = arith.divf %198, %199 : vector<8x128xf32>
    %201 = vector.extract_strided_slice %200 {offsets = [0, 0], sizes = [8, 32], strides = [1, 1]} : vector<8x128xf32> to vector<8x32xf32>
    %202 = vector.extract_strided_slice %200 {offsets = [0, 32], sizes = [8, 32], strides = [1, 1]} : vector<8x128xf32> to vector<8x32xf32>
    %203 = vector.extract_strided_slice %200 {offsets = [0, 96], sizes = [8, 32], strides = [1, 1]} : vector<8x128xf32> to vector<8x32xf32>
    %204 = vector.extract_strided_slice %195 {offsets = [0, 64], sizes = [8, 32], strides = [1, 1]} : vector<8x128xf32> to vector<8x32xf32>
    %205 = math.tanh %204 : vector<8x32xf32>
    %206 = arith.mulf %202, %188 : vector<8x32xf32>
    %207 = arith.mulf %201, %205 : vector<8x32xf32>
    %208 = arith.addf %206, %207 : vector<8x32xf32>
    %209 = math.tanh %208 : vector<8x32xf32>
    %210 = arith.mulf %203, %209 : vector<8x32xf32>
    %211 = arith.addi %4, %c7_i32 : i32
    %c8_i32_45 = arith.constant 8 : i32
    %212 = arith.cmpi slt, %211, %c8_i32_45 : i32
    %213 = arith.select %212, %210, %187 : vector<8x32xf32>
    %214 = arith.select %212, %208, %188 : vector<8x32xf32>
    %c8_i32_46 = arith.constant 8 : i32
    %c0_47 = arith.constant 0 : index
    %c0_48 = arith.constant 0 : index
    %215 = vector.load %arg9[%c0_47, %c0_48] : memref<8x32xf32, #tpu.memory_space<vmem>>, vector<8x32xf32>
    tpu.vector_store %arg9[%c0_47, %c0_48], %213 {strides = array<i32>} : memref<8x32xf32, #tpu.memory_space<vmem>>, vector<8x32xf32>,
    %c0_49 = arith.constant 0 : index
    %c0_50 = arith.constant 0 : index
    %216 = vector.load %arg10[%c0_49, %c0_50] : memref<8x32xf32, #tpu.memory_space<vmem>>, vector<8x32xf32>
    tpu.vector_store %arg10[%c0_49, %c0_50], %214 {strides = array<i32>} : memref<8x32xf32, #tpu.memory_space<vmem>>, vector<8x32xf32>,
    %c0_i32_51 = arith.constant 0 : i32
    %217 = arith.cmpi eq, %arg1, %c0_i32_51 : i32
    %218 = arith.extui %217 : i1 to i32
    %c0_i32_52 = arith.constant 0 : i32
    %219 = arith.cmpi ne, %218, %c0_i32_52 : i32
    scf.if %219 {
      %c0_53 = arith.constant 0 : index
      %c0_54 = arith.constant 0 : index
      %220 = vector.load %arg4[%c0_53, %c0_54] : memref<32x16xf32, #tpu.memory_space<vmem>>, vector<32x16xf32>
      %cst_55 = arith.constant dense<0.000000e+00> : vector<8x16xf32>
      %221 = tpu.matmul %213, %220, %cst_55 {dimension_numbers = #tpu.dot_dimension_numbers<[1], [0], [0], [1], [0, 0, 1, 1], [], []>} : vector<8x32xf32>, vector<32x16xf32>, vector<8x16xf32> -> vector<8x16xf32>
      %c0_56 = arith.constant 0 : index
      %c0_57 = arith.constant 0 : index
      %222 = vector.load %arg5[%c0_56, %c0_57] : memref<1x16xf32, #tpu.memory_space<vmem>>, vector<1x16xf32>
      %223 = vector.broadcast %222 : vector<1x16xf32> to vector<8x16xf32>
      %224 = arith.addf %221, %223 : vector<8x16xf32>
      %cst_58 = arith.constant 0.000000e+00 : f32
      %225 = vector.broadcast %cst_58 : f32 to vector<8x16xf32>
      %226 = arith.maximumf %224, %225 : vector<8x16xf32>
      %c0_59 = arith.constant 0 : index
      %c0_60 = arith.constant 0 : index
      %227 = vector.load %arg6[%c0_59, %c0_60] : memref<16x1xf32, #tpu.memory_space<vmem>>, vector<16x1xf32>
      %cst_61 = arith.constant dense<0.000000e+00> : vector<8x1xf32>
      %228 = tpu.matmul %226, %227, %cst_61 {dimension_numbers = #tpu.dot_dimension_numbers<[1], [0], [0], [1], [0, 0, 1, 1], [], []>} : vector<8x16xf32>, vector<16x1xf32>, vector<8x1xf32> -> vector<8x1xf32>
      %c0_62 = arith.constant 0 : index
      %c0_63 = arith.constant 0 : index
      %229 = vector.load %arg7[%c0_62, %c0_63] : memref<1x1xf32, #tpu.memory_space<vmem>>, vector<1x1xf32>
      %230 = vector.broadcast %229 : vector<1x1xf32> to vector<8x1xf32>
      %231 = arith.addf %228, %230 : vector<8x1xf32>
      %232 = arith.negf %231 : vector<8x1xf32>
      %233 = math.exp %232 : vector<8x1xf32>
      %cst_64 = arith.constant 1.000000e+00 : f32
      %234 = vector.broadcast %cst_64 : f32 to vector<8x1xf32>
      %235 = arith.addf %234, %233 : vector<8x1xf32>
      %236 = arith.divf %234, %235 : vector<8x1xf32>
      %c0_65 = arith.constant 0 : index
      %c0_66 = arith.constant 0 : index
      %237 = vector.load %arg8[%c0_65, %c0_66] : memref<8x1xf32, #tpu.memory_space<vmem>>, vector<8x1xf32>
      tpu.vector_store %arg8[%c0_65, %c0_66], %236 {strides = array<i32>} : memref<8x1xf32, #tpu.memory_space<vmem>>, vector<8x1xf32>,
    } else {
    }
    return
  }
  func.func @transform_0(%arg0: i32, %arg1: i32) -> (i32, i32, i32) {
    %c0_i32 = arith.constant 0 : i32
    %c0_i32_0 = arith.constant 0 : i32
    return %arg1, %arg0, %c0_i32 : i32, i32, i32
  }
  func.func @transform_1(%arg0: i32, %arg1: i32) -> (i32, i32) {
    %c0_i32 = arith.constant 0 : i32
    %c0_i32_0 = arith.constant 0 : i32
    %c0_i32_1 = arith.constant 0 : i32
    return %c0_i32, %c0_i32_0 : i32, i32
  }
  func.func @transform_2(%arg0: i32, %arg1: i32) -> (i32, i32) {
    %c0_i32 = arith.constant 0 : i32
    %c0_i32_0 = arith.constant 0 : i32
    %c0_i32_1 = arith.constant 0 : i32
    return %c0_i32, %c0_i32_0 : i32, i32
  }
  func.func @transform_3(%arg0: i32, %arg1: i32) -> (i32, i32) {
    %c0_i32 = arith.constant 0 : i32
    %c0_i32_0 = arith.constant 0 : i32
    %c0_i32_1 = arith.constant 0 : i32
    return %c0_i32, %c0_i32_0 : i32, i32
  }
  func.func @transform_4(%arg0: i32, %arg1: i32) -> (i32, i32) {
    %c0_i32 = arith.constant 0 : i32
    %c0_i32_0 = arith.constant 0 : i32
    %c0_i32_1 = arith.constant 0 : i32
    return %c0_i32, %c0_i32_0 : i32, i32
  }
  func.func @transform_5(%arg0: i32, %arg1: i32) -> (i32, i32) {
    %c0_i32 = arith.constant 0 : i32
    %c0_i32_0 = arith.constant 0 : i32
    %c0_i32_1 = arith.constant 0 : i32
    return %c0_i32, %c0_i32_0 : i32, i32
  }
  func.func @transform_6(%arg0: i32, %arg1: i32) -> (i32, i32) {
    %c0_i32 = arith.constant 0 : i32
    %c0_i32_0 = arith.constant 0 : i32
    return %arg0, %c0_i32 : i32, i32
  }
}

</mosaic_0001>

<bundles_post_ra>
// kernel: concentration_predictor.1
= control target key start
LH: loop header
LB: loop body
LE: loop exit
PB: predicated region body
PF: predicated region fallthrough
CT: control target
= control target key end

     0   :  { %vm30_vm0 = vcmask 261120   ;;  %v809_v1 = vmov 0.0   ;;  %s810_s26 = smov 64   ;;  %s811_s27 = smov 32   ;;  %s939_s1 = inlined_call_operand.vmem [shape: bf16[32,128], index: 1, kind: input, shape index: {}]   ;;  %s940_s0 = inlined_call_operand.vmem [shape: bf16[8,8,128], index: 0, kind: input, shape index: {}]   ;;  %s941_s3 = inlined_call_operand.vmem [shape: f32[1,16], index: 3, kind: input, shape index: {}]   ;;  %s942_s2 = inlined_call_operand.vmem [shape: f32[32,16], index: 2, kind: input, shape index: {}]   ;;  %s943_s4 = inlined_call_operand.vmem [shape: f32[16,1], index: 4, kind: input, shape index: {}]   ;;  %s944_s5 = inlined_call_operand.<no memory space> [shape: f32[1,1], index: 5, kind: input, shape index: {}]   ;;  %s945_s6 = inlined_call_operand.vmem [shape: f32[8,1], index: 6, kind: output, shape index: {}]  }
   0x1   :  { %v734_v0 = vld [vmem:[%s939_s1 + $0x8] sm:$0xff]  ;;  %31 = vst.msk [vmem:[#allocation2] sm:$0xff] %vm30_vm0, %v809_v1  ;;  %v733_v2 = vld [vmem:[%s939_s1] sm:$0xff] }
   0x2   :  { %32 = vst.msk [vmem:[#allocation3] sm:$0xff] %vm30_vm0, %v809_v1  ;;  %65 = vmatpush.bf16.msra.mxu0 %v734_v0  ;;  %140 = vmatpush.bf16.msra.mxu1 %v734_v0  ;;  %v40_v5 = vld [vmem:[%s940_s0] sm:$0xff]  }
   0x3   :  { %208 = vmatpush.bf16.msra.mxu2 %v734_v0  ;;  %276 = vmatpush.bf16.msra.mxu3 %v734_v0  ;;  %v41_v6 = vunpack.c.l.bf16 %v40_v5  ;;  %v126_v36 = vunpack.c.h.bf16 %v40_v5 }
   0x6   :  { %66 = vmatpush.bf16.msra.mxu0 %v733_v2  ;;  %141 = vmatpush.bf16.msra.mxu1 %v733_v2 }
   0x7   :  { %209 = vmatpush.bf16.msra.mxu2 %v733_v2  ;;  %277 = vmatpush.bf16.msra.mxu3 %v733_v2 }
   0x8   :  { %v38_v3 = vld [vmem:[#allocation2] sm:$0xff] }
   0x9   :  { %v42_v4 = vpack.c.bf16 %v38_v3, %v38_v3  ;;  %v39_v11 = vld [vmem:[#allocation3] sm:$0xff] }
   0xa   :  { %344 = vmatpush.bf16.msrb.mxu0 %v734_v0  ;;  %412 = vmatpush.bf16.msrb.mxu1 %v734_v0 }
   0xb   :  { %480 = vmatpush.bf16.msrb.mxu2 %v734_v0  ;;  %548 = vmatpush.bf16.msrb.mxu3 %v734_v0  ;;  %v712_v0 = vld [vmem:[%s940_s0 + $0x8] sm:$0xff]  }
   0xc   :  { %707 = vmatmul.msk.bf16.vlgmr.msra.gmra.mxu0 %vm30_vm0, %v42_v4  ;;  %v194_v1 = vunpack.c.l.bf16 %v712_v0 }
   0xe   :  { %345 = vmatpush.bf16.msrb.mxu0 %v733_v2  ;;  %413 = vmatpush.bf16.msrb.mxu1 %v733_v2 }
   0xf   :  { %481 = vmatpush.bf16.msrb.mxu2 %v733_v2  ;;  %549 = vmatpush.bf16.msrb.mxu3 %v733_v2 }
  0x89   :  { %v68_v7 = vpop.f32.mrf.mxu0 }
  0x8a   :  { %v72_v8 = vadd.f32 %v68_v7, %v41_v6 }
  0x8c   :  { %741 = vtanh.f32 %v72_v8  ;;  %v708_v12 = vmul.f32 -1.442695, %v72_v8 }
  0x8e   :  { %743 = vpow2.f32 %v708_v12 }
  0x91   :  { %v70_v9 = vpop.f32.mrf.mxu0 }
  0x92   :  { %v742_v10 = vpop.eup %741 }
  0x93   :  { %99 = vrot.lane.b32.xlu0 %v742_v10, %s810_s26 }
  0x94   :  { %v744_v13 = vpop.eup %743 }
  0x95   :  { %v76_v14 = vadd.f32 1.0, %v744_v13 }
  0x97   :  { %745 = vrcp.f32 %v76_v14  ;;  %v88_v20 = vand.u32 2147483648, %v76_v14  ;;  %vm82_vm2 = vweird.f32 %v76_v14  ;;  %v86_v21 = vand.u32 2147483647, %v76_v14 }
  0x99   :  { %v89_v23 = vor.u32 1.1754944e-38, %v88_v20  ;;  %vm87_vm4 = vcmp.eq.f32.partialorder %v86_v21, 8.507059e+37 }
  0x9b   :  { %94 = vrot.lane.b32.xlu0 %v39_v11, %s811_s27 }
  0x9d   :  { %v746_v15 = vpop.eup %745 }
  0x9e   :  { %v78_v16 = vmul.f32 %v746_v15, %v76_v14  ;;  %vm83_vm1 = vweird.f32 %v746_v15 }
  0x9f   :  { %vm84_vm3 = vmor %vm82_vm2, %vm83_vm1 }
  0xa0   :  { %v79_v17 = vsub.f32 1.0, %v78_v16 }
  0xa2   :  { %v80_v18 = vmul.f32 %v746_v15, %v79_v17 }
  0xa4   :  { %v81_v19 = vadd.f32 %v746_v15, %v80_v18 }
  0xa6   :  { %v85_v22 = vsel %vm84_vm3, %v746_v15, %v81_v19 }
  0xa7   :  { %v90_v25 = vsel %vm87_vm4, %v89_v23, %v85_v22 }
 0x105   :  { %v100_v24 = vpop.permute.xlu0 %99 }
 0x106   :  { %v102_v26 = vmul.f32 %v100_v24, %v90_v25 }
 0x108   :  { %104 = vrot.lane.b32.xlu1 %v102_v26, %s811_s27 }
 0x10d   :  { %v95_v27 = vpop.permute.xlu0 %94 }
 0x10e   :  { %v97_v28 = vmul.f32 %v95_v27, %v90_v25 }
 0x17a   :  { %v105_v29 = vpop.permute.xlu1 %104 }
 0x17b   :  { %v107_v30 = vadd.f32 %v105_v29, %v97_v28  ;;  %v262_v29 = vunpack.c.h.bf16 %v712_v0 }
 0x17d   :  { %747 = vtanh.f32 %v107_v30 }
 0x183   :  { %v748_v31 = vpop.eup %747 }
 0x184   :  { %110 = vrot.lane.b32.xlu1 %v748_v31, %s810_s26 }
 0x1f6   :  { %v111_v32 = vpop.permute.xlu1 %110 }
 0x1f7   :  { %v113_v33 = vmul.f32 %v111_v32, %v90_v25 }
 0x1f9   :  { %v127_v34 = vpack.c.bf16 %v113_v33, %v113_v33 }
 0x1fb   :  { %129 = vrot.lane.b32.xlu2 %v127_v34, %s811_s27 }
 0x255   :  { %v130_v35 = vpop.permute.xlu2 %129 }
 0x256   :  { %710 = vmatmul.msk.bf16.vlgmr.msra.gmra.mxu1 %vm30_vm0, %v130_v35 }
 0x2d3   :  { %v143_v37 = vpop.f32.mrf.mxu1 }
 0x2d4   :  { %v147_v38 = vadd.f32 %v143_v37, %v126_v36 }
 0x2d6   :  { %749 = vtanh.f32 %v147_v38  ;;  %v711_v41 = vmul.f32 -1.442695, %v147_v38 }
 0x2d8   :  { %751 = vpow2.f32 %v711_v41 }
 0x2db   :  { %v145_v39 = vpop.f32.mrf.mxu1 }
 0x2dc   :  { %v750_v40 = vpop.eup %749 }
 0x2dd   :  { %170 = vrot.lane.b32.xlu2 %v750_v40, %s810_s26 }
 0x2de   :  { %v752_v42 = vpop.eup %751 }
 0x2df   :  { %v151_v43 = vadd.f32 1.0, %v752_v42 }
 0x2e1   :  { %753 = vrcp.f32 %v151_v43  ;;  %v163_v49 = vand.u32 2147483648, %v151_v43  ;;  %vm157_vm6 = vweird.f32 %v151_v43  ;;  %v161_v50 = vand.u32 2147483647, %v151_v43 }
 0x2e3   :  { %v164_v52 = vor.u32 1.1754944e-38, %v163_v49  ;;  %vm162_vm8 = vcmp.eq.f32.partialorder %v161_v50, 8.507059e+37 }
 0x2e7   :  { %v754_v44 = vpop.eup %753 }
 0x2e8   :  { %v153_v45 = vmul.f32 %v754_v44, %v151_v43  ;;  %vm158_vm5 = vweird.f32 %v754_v44 }
 0x2e9   :  { %vm159_vm7 = vmor %vm157_vm6, %vm158_vm5 }
 0x2ea   :  { %v154_v46 = vsub.f32 1.0, %v153_v45 }
 0x2ec   :  { %v155_v47 = vmul.f32 %v754_v44, %v154_v46 }
 0x2ee   :  { %v156_v48 = vadd.f32 %v754_v44, %v155_v47 }
 0x2f0   :  { %v160_v51 = vsel %vm159_vm7, %v754_v44, %v156_v48 }
 0x2f1   :  { %v165_v54 = vsel %vm162_vm8, %v164_v52, %v160_v51 }
 0x2f2   :  { %v168_v56 = vmul.f32 %v165_v54, %v107_v30 }
 0x337   :  { %v171_v53 = vpop.permute.xlu2 %170 }
 0x338   :  { %v173_v55 = vmul.f32 %v171_v53, %v165_v54 }
 0x33a   :  { %175 = vrot.lane.b32.xlu0 %v173_v55, %s811_s27 }
 0x3ac   :  { %v176_v57 = vpop.permute.xlu0 %175 }
 0x3ad   :  { %v178_v58 = vadd.f32 %v176_v57, %v168_v56  ;;  %v718_v57 = vld [vmem:[%s940_s0 + $0x10] sm:$0xff]  }
 0x3af   :  { %755 = vtanh.f32 %v178_v58 }
 0x3b5   :  { %v756_v59 = vpop.eup %755 }
 0x3b6   :  { %181 = vrot.lane.b32.xlu1 %v756_v59, %s810_s26 }
 0x428   :  { %v182_v60 = vpop.permute.xlu1 %181 }
 0x429   :  { %v184_v61 = vmul.f32 %v182_v60, %v165_v54 }
 0x42b   :  { %v195_v62 = vpack.c.bf16 %v184_v61, %v184_v61 }
 0x42d   :  { %197 = vrot.lane.b32.xlu2 %v195_v62, %s811_s27 }
 0x487   :  { %v198_v63 = vpop.permute.xlu2 %197 }
 0x488   :  { %713 = vmatmul.msk.bf16.vlgmr.msra.gmra.mxu2 %vm30_vm0, %v198_v63 }
 0x50b   :  { %v211_v2 = vpop.f32.mrf.mxu2 }
 0x50c   :  { %v215_v3 = vadd.f32 %v211_v2, %v194_v1 }
 0x50e   :  { %757 = vtanh.f32 %v215_v3  ;;  %v714_v6 = vmul.f32 -1.442695, %v215_v3 }
 0x510   :  { %759 = vpow2.f32 %v714_v6 }
 0x513   :  { %v213_v4 = vpop.f32.mrf.mxu2 }
 0x514   :  { %v758_v5 = vpop.eup %757 }
 0x515   :  { %238 = vrot.lane.b32.xlu0 %v758_v5, %s810_s26 }
 0x516   :  { %v760_v7 = vpop.eup %759 }
 0x517   :  { %v219_v8 = vadd.f32 1.0, %v760_v7 }
 0x519   :  { %761 = vrcp.f32 %v219_v8  ;;  %v231_v14 = vand.u32 2147483648, %v219_v8  ;;  %vm225_vm10 = vweird.f32 %v219_v8  ;;  %v229_v15 = vand.u32 2147483647, %v219_v8 }
 0x51b   :  { %v232_v17 = vor.u32 1.1754944e-38, %v231_v14  ;;  %vm230_vm12 = vcmp.eq.f32.partialorder %v229_v15, 8.507059e+37 }
 0x51f   :  { %v762_v9 = vpop.eup %761 }
 0x520   :  { %v221_v10 = vmul.f32 %v762_v9, %v219_v8  ;;  %vm226_vm9 = vweird.f32 %v762_v9 }
 0x521   :  { %vm227_vm11 = vmor %vm225_vm10, %vm226_vm9 }
 0x522   :  { %v222_v11 = vsub.f32 1.0, %v221_v10 }
 0x524   :  { %v223_v12 = vmul.f32 %v762_v9, %v222_v11 }
 0x526   :  { %v224_v13 = vadd.f32 %v762_v9, %v223_v12 }
 0x528   :  { %v228_v16 = vsel %vm227_vm11, %v762_v9, %v224_v13 }
 0x529   :  { %v233_v19 = vsel %vm230_vm12, %v232_v17, %v228_v16 }
 0x52a   :  { %v236_v21 = vmul.f32 %v233_v19, %v178_v58  ;;  %v330_v58 = vunpack.c.l.bf16 %v718_v57 }
 0x587   :  { %v239_v18 = vpop.permute.xlu0 %238 }
 0x588   :  { %v241_v20 = vmul.f32 %v239_v18, %v233_v19 }
 0x58a   :  { %243 = vrot.lane.b32.xlu1 %v241_v20, %s811_s27 }
 0x5fc   :  { %v244_v22 = vpop.permute.xlu1 %243 }
 0x5fd   :  { %v246_v23 = vadd.f32 %v244_v22, %v236_v21  ;;  %v398_v22 = vunpack.c.h.bf16 %v718_v57 }
 0x5ff   :  { %763 = vtanh.f32 %v246_v23 }
 0x605   :  { %v764_v24 = vpop.eup %763 }
 0x606   :  { %249 = vrot.lane.b32.xlu2 %v764_v24, %s810_s26 }
 0x660   :  { %v250_v25 = vpop.permute.xlu2 %249 }
 0x661   :  { %v252_v26 = vmul.f32 %v250_v25, %v233_v19 }
 0x663   :  { %v263_v27 = vpack.c.bf16 %v252_v26, %v252_v26 }
 0x665   :  { %265 = vrot.lane.b32.xlu0 %v263_v27, %s811_s27 }
 0x6d7   :  { %v266_v28 = vpop.permute.xlu0 %265 }
 0x6d8   :  { %716 = vmatmul.msk.bf16.vlgmr.msra.gmra.mxu3 %vm30_vm0, %v266_v28 }
 0x75b   :  { %v279_v30 = vpop.f32.mrf.mxu3 }
 0x75c   :  { %v283_v31 = vadd.f32 %v279_v30, %v262_v29 }
 0x75e   :  { %765 = vtanh.f32 %v283_v31  ;;  %v717_v34 = vmul.f32 -1.442695, %v283_v31 }
 0x760   :  { %767 = vpow2.f32 %v717_v34 }
 0x763   :  { %v281_v32 = vpop.f32.mrf.mxu3 }
 0x764   :  { %v766_v33 = vpop.eup %765 }
 0x765   :  { %306 = vrot.lane.b32.xlu1 %v766_v33, %s810_s26 }
 0x766   :  { %v768_v35 = vpop.eup %767 }
 0x767   :  { %v287_v36 = vadd.f32 1.0, %v768_v35 }
 0x769   :  { %769 = vrcp.f32 %v287_v36  ;;  %v299_v42 = vand.u32 2147483648, %v287_v36  ;;  %vm293_vm14 = vweird.f32 %v287_v36  ;;  %v297_v43 = vand.u32 2147483647, %v287_v36 }
 0x76b   :  { %v300_v45 = vor.u32 1.1754944e-38, %v299_v42  ;;  %vm298_vm1 = vcmp.eq.f32.partialorder %v297_v43, 8.507059e+37 }
 0x76f   :  { %v770_v37 = vpop.eup %769 }
 0x770   :  { %v289_v38 = vmul.f32 %v770_v37, %v287_v36  ;;  %vm294_vm13 = vweird.f32 %v770_v37 }
 0x771   :  { %vm295_vm15 = vmor %vm293_vm14, %vm294_vm13 }
 0x772   :  { %v290_v39 = vsub.f32 1.0, %v289_v38 }
 0x774   :  { %v291_v40 = vmul.f32 %v770_v37, %v290_v39 }
 0x776   :  { %v292_v41 = vadd.f32 %v770_v37, %v291_v40 }
 0x778   :  { %v296_v44 = vsel %vm295_vm15, %v770_v37, %v292_v41 }
 0x779   :  { %v301_v47 = vsel %vm298_vm1, %v300_v45, %v296_v44 }
 0x77a   :  { %v304_v49 = vmul.f32 %v301_v47, %v246_v23 }
 0x7d7   :  { %v307_v46 = vpop.permute.xlu1 %306 }
 0x7d8   :  { %v309_v48 = vmul.f32 %v307_v46, %v301_v47 }
 0x7da   :  { %311 = vrot.lane.b32.xlu2 %v309_v48, %s811_s27 }
 0x834   :  { %v312_v50 = vpop.permute.xlu2 %311 }
 0x835   :  { %v314_v51 = vadd.f32 %v312_v50, %v304_v49  ;;  %v724_v50 = vld [vmem:[%s940_s0 + $0x18] sm:$0xff]   ;;  %s812_s0 = smov 96  }
 0x837   :  { %771 = vtanh.f32 %v314_v51 }
 0x83d   :  { %v772_v52 = vpop.eup %771 }
 0x83e   :  { %317 = vrot.lane.b32.xlu0 %v772_v52, %s810_s26 }
 0x8b0   :  { %v318_v53 = vpop.permute.xlu0 %317 }
 0x8b1   :  { %v320_v54 = vmul.f32 %v318_v53, %v301_v47 }
 0x8b3   :  { %v331_v55 = vpack.c.bf16 %v320_v54, %v320_v54 }
 0x8b5   :  { %333 = vrot.lane.b32.xlu1 %v331_v55, %s811_s27 }
 0x927   :  { %v334_v56 = vpop.permute.xlu1 %333 }
 0x928   :  { %719 = vmatmul.msk.bf16.vlgmr.msrb.gmra.mxu0 %vm30_vm0, %v334_v56 }
 0x9a5   :  { %v347_v59 = vpop.f32.mrf.mxu0 }
 0x9a6   :  { %v351_v60 = vadd.f32 %v347_v59, %v330_v58 }
 0x9a8   :  { %773 = vtanh.f32 %v351_v60  ;;  %v720_v63 = vmul.f32 -1.442695, %v351_v60 }
 0x9aa   :  { %775 = vpow2.f32 %v720_v63 }
 0x9ad   :  { %v349_v61 = vpop.f32.mrf.mxu0 }
 0x9ae   :  { %v774_v62 = vpop.eup %773 }
 0x9af   :  { %374 = vrot.lane.b32.xlu2 %v774_v62, %s810_s26 }
 0x9b0   :  { %v776_v0 = vpop.eup %775 }
 0x9b1   :  { %v355_v1 = vadd.f32 1.0, %v776_v0 }
 0x9b3   :  { %777 = vrcp.f32 %v355_v1  ;;  %v367_v7 = vand.u32 2147483648, %v355_v1  ;;  %vm361_vm3 = vweird.f32 %v355_v1  ;;  %v365_v8 = vand.u32 2147483647, %v355_v1 }
 0x9b5   :  { %v368_v10 = vor.u32 1.1754944e-38, %v367_v7  ;;  %vm366_vm5 = vcmp.eq.f32.partialorder %v365_v8, 8.507059e+37 }
 0x9b9   :  { %v778_v2 = vpop.eup %777 }
 0x9ba   :  { %v357_v3 = vmul.f32 %v778_v2, %v355_v1  ;;  %vm362_vm2 = vweird.f32 %v778_v2 }
 0x9bb   :  { %vm363_vm4 = vmor %vm361_vm3, %vm362_vm2  ;;  %vm650_vm3 = vcmask 130048  }
 0x9bc   :  { %v358_v4 = vsub.f32 1.0, %v357_v3 }
 0x9be   :  { %v359_v5 = vmul.f32 %v778_v2, %v358_v4 }
 0x9c0   :  { %v360_v6 = vadd.f32 %v778_v2, %v359_v5 }
 0x9c2   :  { %v364_v9 = vsel %vm363_vm4, %v778_v2, %v360_v6 }
 0x9c3   :  { %v369_v12 = vsel %vm366_vm5, %v368_v10, %v364_v9 }
 0x9c4   :  { %v372_v14 = vmul.f32 %v369_v12, %v314_v51  ;;  %v466_v51 = vunpack.c.l.bf16 %v724_v50 }
 0xa09   :  { %v375_v11 = vpop.permute.xlu2 %374 }
 0xa0a   :  { %v377_v13 = vmul.f32 %v375_v11, %v369_v12 }
 0xa0c   :  { %379 = vrot.lane.b32.xlu0 %v377_v13, %s811_s27 }
 0xa7e   :  { %v380_v15 = vpop.permute.xlu0 %379 }
 0xa7f   :  { %v382_v16 = vadd.f32 %v380_v15, %v372_v14  ;;  %v534_v15 = vunpack.c.h.bf16 %v724_v50  ;;  %v739_v50 = vld [vmem:[%s941_s3] ss:$0 sm:$0xff] }
 0xa81   :  { %779 = vtanh.f32 %v382_v16 }
 0xa87   :  { %v780_v17 = vpop.eup %779 }
 0xa88   :  { %385 = vrot.lane.b32.xlu1 %v780_v17, %s810_s26 }
 0xafa   :  { %v386_v18 = vpop.permute.xlu1 %385 }
 0xafb   :  { %v388_v19 = vmul.f32 %v386_v18, %v369_v12 }
 0xafd   :  { %v399_v20 = vpack.c.bf16 %v388_v19, %v388_v19 }
 0xaff   :  { %401 = vrot.lane.b32.xlu2 %v399_v20, %s811_s27 }
 0xb59   :  { %v402_v21 = vpop.permute.xlu2 %401 }
 0xb5a   :  { %722 = vmatmul.msk.bf16.vlgmr.msrb.gmra.mxu1 %vm30_vm0, %v402_v21 }
 0xbd7   :  { %v415_v23 = vpop.f32.mrf.mxu1 }
 0xbd8   :  { %v419_v24 = vadd.f32 %v415_v23, %v398_v22 }
 0xbda   :  { %781 = vtanh.f32 %v419_v24  ;;  %v723_v27 = vmul.f32 -1.442695, %v419_v24 }
 0xbdc   :  { %783 = vpow2.f32 %v723_v27 }
 0xbdf   :  { %v417_v25 = vpop.f32.mrf.mxu1 }
 0xbe0   :  { %v782_v26 = vpop.eup %781 }
 0xbe1   :  { %442 = vrot.lane.b32.xlu0 %v782_v26, %s810_s26 }
 0xbe2   :  { %v784_v28 = vpop.eup %783 }
 0xbe3   :  { %v423_v29 = vadd.f32 1.0, %v784_v28 }
 0xbe5   :  { %785 = vrcp.f32 %v423_v29  ;;  %v435_v35 = vand.u32 2147483648, %v423_v29  ;;  %vm429_vm7 = vweird.f32 %v423_v29  ;;  %v433_v36 = vand.u32 2147483647, %v423_v29 }
 0xbe7   :  { %v436_v38 = vor.u32 1.1754944e-38, %v435_v35  ;;  %vm434_vm9 = vcmp.eq.f32.partialorder %v433_v36, 8.507059e+37 }
 0xbeb   :  { %v786_v30 = vpop.eup %785 }
 0xbec   :  { %v425_v31 = vmul.f32 %v786_v30, %v423_v29  ;;  %vm430_vm6 = vweird.f32 %v786_v30 }
 0xbed   :  { %vm431_vm8 = vmor %vm429_vm7, %vm430_vm6  ;;  %vm693_vm6 = vcmask 7168  }
 0xbee   :  { %v426_v32 = vsub.f32 1.0, %v425_v31 }
 0xbf0   :  { %v427_v33 = vmul.f32 %v786_v30, %v426_v32 }
 0xbf2   :  { %v428_v34 = vadd.f32 %v786_v30, %v427_v33 }
 0xbf4   :  { %v432_v37 = vsel %vm431_vm8, %v786_v30, %v428_v34 }
 0xbf5   :  { %v437_v40 = vsel %vm434_vm9, %v436_v38, %v432_v37 }
 0xbf6   :  { %v440_v42 = vmul.f32 %v437_v40, %v382_v16 }
 0xc53   :  { %v443_v39 = vpop.permute.xlu0 %442 }
 0xc54   :  { %v445_v41 = vmul.f32 %v443_v39, %v437_v40  ;;  %v616_v39 = vld [vmem:[%s942_s2 + $0x18] sm:$0xff] }
 0xc55   :  { %635 = vmatpush.msra.mxu0 %v616_v39 }
 0xc56   :  { %447 = vrot.lane.b32.xlu1 %v445_v41, %s811_s27  ;;  %v614_v41 = vld [vmem:[%s942_s2 + $0x8] sm:$0xff] }
 0xcc8   :  { %v448_v43 = vpop.permute.xlu1 %447 }
 0xcc9   :  { %v450_v44 = vadd.f32 %v448_v43, %v440_v42  ;;  %v613_v42 = vld [vmem:[%s942_s2] sm:$0xff] }
 0xccb   :  { %787 = vtanh.f32 %v450_v44 }
 0xcd1   :  { %v788_v45 = vpop.eup %787 }
 0xcd2   :  { %453 = vrot.lane.b32.xlu2 %v788_v45, %s810_s26 }
 0xd2c   :  { %v454_v46 = vpop.permute.xlu2 %453 }
 0xd2d   :  { %v456_v47 = vmul.f32 %v454_v46, %v437_v40  ;;  %v615_v40 = vld [vmem:[%s942_s2 + $0x10] sm:$0xff]  ;;  %v645_v46 = vld [vmem:[%s943_s4 + $0x8] sm:$0xff] }
 0xd2e   :  { %636 = vmatpush.msra.mxu0 %v615_v40  ;;  %668 = vmatpush.msra.mxu1 %v645_v46 }
 0xd2f   :  { %v467_v48 = vpack.c.bf16 %v456_v47, %v456_v47  ;;  %v644_v47 = vld [vmem:[%s943_s4] sm:$0xff] }
 0xd30   :  { %637 = vmatpush.msra.mxu0 %v614_v41  ;;  %669 = vmatpush.msra.mxu1 %v644_v47 }
 0xd31   :  { %469 = vrot.lane.b32.xlu0 %v467_v48, %s811_s27 }
 0xd32   :  { %638 = vmatpush.msra.mxu0 %v613_v42 }
 0xda3   :  { %v470_v49 = vpop.permute.xlu0 %469 }
 0xda4   :  { %725 = vmatmul.msk.bf16.vlgmr.msrb.gmra.mxu2 %vm30_vm0, %v470_v49  ;;  %v11_v49 = vstv %s944_s5 }
 0xda5   :  { %12 = vst [vmem:[#allocation4] sm:$0x1] %v11_v49 }
 0xe27   :  { %v483_v52 = vpop.f32.mrf.mxu2 }
 0xe28   :  { %v487_v53 = vadd.f32 %v483_v52, %v466_v51 }
 0xe2a   :  { %789 = vtanh.f32 %v487_v53  ;;  %v726_v56 = vmul.f32 -1.442695, %v487_v53 }
 0xe2c   :  { %791 = vpow2.f32 %v726_v56 }
 0xe2f   :  { %v485_v54 = vpop.f32.mrf.mxu2 }
 0xe30   :  { %v790_v55 = vpop.eup %789  ;;  %v740_v54 = vld [vmem:[#allocation4] ss:$0 sm:$0xff] }
 0xe31   :  { %510 = vrot.lane.b32.xlu1 %v790_v55, %s810_s26 }
 0xe32   :  { %v792_v57 = vpop.eup %791 }
 0xe33   :  { %v491_v58 = vadd.f32 1.0, %v792_v57 }
 0xe35   :  { %793 = vrcp.f32 %v491_v58  ;;  %v503_v0 = vand.u32 2147483648, %v491_v58  ;;  %vm497_vm11 = vweird.f32 %v491_v58  ;;  %v501_v1 = vand.u32 2147483647, %v491_v58 }
 0xe37   :  { %v504_v3 = vor.u32 1.1754944e-38, %v503_v0  ;;  %vm502_vm13 = vcmp.eq.f32.partialorder %v501_v1, 8.507059e+37 }
 0xe3b   :  { %v794_v59 = vpop.eup %793 }
 0xe3c   :  { %v493_v60 = vmul.f32 %v794_v59, %v491_v58  ;;  %vm498_vm10 = vweird.f32 %v794_v59 }
 0xe3d   :  { %vm499_vm12 = vmor %vm497_vm11, %vm498_vm10 }
 0xe3e   :  { %v494_v61 = vsub.f32 1.0, %v493_v60 }
 0xe40   :  { %v495_v62 = vmul.f32 %v794_v59, %v494_v61 }
 0xe42   :  { %v496_v63 = vadd.f32 %v794_v59, %v495_v62 }
 0xe44   :  { %v500_v2 = vsel %vm499_vm12, %v794_v59, %v496_v63 }
 0xe45   :  { %v505_v5 = vsel %vm502_vm13, %v504_v3, %v500_v2 }
 0xe46   :  { %v508_v7 = vmul.f32 %v505_v5, %v450_v44 }
 0xea3   :  { %v511_v4 = vpop.permute.xlu1 %510 }
 0xea4   :  { %v513_v6 = vmul.f32 %v511_v4, %v505_v5 }
 0xea6   :  { %515 = vrot.lane.b32.xlu2 %v513_v6, %s811_s27 }
 0xf00   :  { %v516_v8 = vpop.permute.xlu2 %515 }
 0xf01   :  { %v518_v9 = vadd.f32 %v516_v8, %v508_v7 }
 0xf03   :  { %795 = vtanh.f32 %v518_v9 }
 0xf09   :  { %v796_v10 = vpop.eup %795 }
 0xf0a   :  { %521 = vrot.lane.b32.xlu0 %v796_v10, %s810_s26 }
 0xf7c   :  { %v522_v11 = vpop.permute.xlu0 %521 }
 0xf7d   :  { %v524_v12 = vmul.f32 %v522_v11, %v505_v5 }
 0xf7f   :  { %v535_v13 = vpack.c.bf16 %v524_v12, %v524_v12 }
 0xf81   :  { %537 = vrot.lane.b32.xlu1 %v535_v13, %s811_s27 }
 0xff3   :  { %v538_v14 = vpop.permute.xlu1 %537 }
 0xff4   :  { %728 = vmatmul.msk.bf16.vlgmr.msrb.gmra.mxu3 %vm30_vm0, %v538_v14 }
0x1077   :  { %v551_v16 = vpop.f32.mrf.mxu3 }
0x1078   :  { %v555_v17 = vadd.f32 %v551_v16, %v534_v15 }
0x107a   :  { %797 = vtanh.f32 %v555_v17  ;;  %v729_v20 = vmul.f32 -1.442695, %v555_v17 }
0x107c   :  { %799 = vpow2.f32 %v729_v20 }
0x107f   :  { %v553_v18 = vpop.f32.mrf.mxu3 }
0x1080   :  { %v798_v19 = vpop.eup %797 }
0x1081   :  { %578 = vrot.lane.b32.xlu2 %v798_v19, %s810_s26 }
0x1082   :  { %v800_v21 = vpop.eup %799 }
0x1083   :  { %v559_v22 = vadd.f32 1.0, %v800_v21 }
0x1085   :  { %801 = vrcp.f32 %v559_v22  ;;  %v571_v28 = vand.u32 2147483648, %v559_v22  ;;  %vm565_vm15 = vweird.f32 %v559_v22  ;;  %v569_v29 = vand.u32 2147483647, %v559_v22 }
0x1087   :  { %v572_v31 = vor.u32 1.1754944e-38, %v571_v28  ;;  %vm570_vm2 = vcmp.eq.f32.partialorder %v569_v29, 8.507059e+37 }
0x108b   :  { %v802_v23 = vpop.eup %801 }
0x108c   :  { %v561_v24 = vmul.f32 %v802_v23, %v559_v22  ;;  %vm566_vm14 = vweird.f32 %v802_v23 }
0x108d   :  { %vm567_vm1 = vmor %vm565_vm15, %vm566_vm14 }
0x108e   :  { %v562_v25 = vsub.f32 1.0, %v561_v24 }
0x1090   :  { %v563_v26 = vmul.f32 %v802_v23, %v562_v25 }
0x1092   :  { %v564_v27 = vadd.f32 %v802_v23, %v563_v26 }
0x1094   :  { %v568_v30 = vsel %vm567_vm1, %v802_v23, %v564_v27 }
0x1095   :  { %v573_v33 = vsel %vm570_vm2, %v572_v31, %v568_v30 }
0x1096   :  { %v576_v35 = vmul.f32 %v573_v33, %v518_v9 }
0x10db   :  { %v579_v32 = vpop.permute.xlu2 %578 }
0x10dc   :  { %v581_v34 = vmul.f32 %v579_v32, %v573_v33 }
0x10de   :  { %583 = vrot.lane.b32.xlu0 %v581_v34, %s811_s27 }
0x1150   :  { %v584_v36 = vpop.permute.xlu0 %583 }
0x1151   :  { %v586_v37 = vadd.f32 %v584_v36, %v576_v35 }
0x1153   :  { %803 = vtanh.f32 %v586_v37  ;;  %606 = vrot.lane.b32.xlu0 %v586_v37, %s812_s0 }
0x1159   :  { %v804_v38 = vpop.eup %803 }
0x115a   :  { %589 = vrot.lane.b32.xlu1 %v804_v38, %s810_s26 }
0x11c5   :  { %v607_v43 = vpop.permute.xlu0 %606 }
0x11c6   :  { %609 = vst.msk [vmem:[#allocation3] sm:$0xff] %vm30_vm0, %v607_v43 }
0x11cc   :  { %v590_v44 = vpop.permute.xlu1 %589 }
0x11cd   :  { %v592_v45 = vmul.f32 %v590_v44, %v573_v33 }
0x11cf   :  { %601 = vrot.lane.b32.xlu2 %v592_v45, %s811_s27 }
0x1229   :  { %v602_v48 = vpop.permute.xlu2 %601 }
0x122a   :  { %604 = vst.msk [vmem:[#allocation2] sm:$0xff] %vm30_vm0, %v602_v48  ;;  %730 = vmatmul.msk.f32.vlgmr.msra.gmra.mxu0 %vm30_vm0, %v602_v48 }
0x12a7   :  { %v640_v51 = vpop.f32.mrf.mxu0 }
0x12a8   :  { %v641_v52 = vadd.f32 %v739_v50, %v640_v51 }
0x12aa   :  { %v643_v53 = vmax.f32 %v641_v52, 0.0 }
0x12ac   :  { %731 = vmatmul.msk.f32.vlgmr.msra.gmra.mxu1 %vm650_vm3, %v643_v53 }
0x1329   :  { %v671_v55 = vpop.f32.mrf.mxu1 }
0x132a   :  { %v672_v56 = vadd.f32 %v740_v54, %v671_v55 }
0x132c   :  { %v732_v57 = vmul.f32 -1.442695, %v672_v56 }
0x132e   :  { %805 = vpow2.f32 %v732_v57 }
0x1334   :  { %v806_v58 = vpop.eup %805 }
0x1335   :  { %v677_v59 = vadd.f32 1.0, %v806_v58 }
0x1337   :  { %807 = vrcp.f32 %v677_v59  ;;  %v689_v63 = vand.u32 2147483648, %v677_v59  ;;  %v687_v1 = vand.u32 2147483647, %v677_v59  ;;  %vm683_vm4 = vweird.f32 %v677_v59 }
0x1339   :  { %v690_v3 = vor.u32 1.1754944e-38, %v689_v63  ;;  %vm688_vm7 = vcmp.eq.f32.partialorder %v687_v1, 8.507059e+37 }
0x133d   :  { %v808_v60 = vpop.eup %807 }
0x133e   :  { %v679_v61 = vmul.f32 %v808_v60, %v677_v59  ;;  %vm684_vm0 = vweird.f32 %v808_v60 }
0x133f   :  { %vm685_vm5 = vmor %vm683_vm4, %vm684_vm0 }
0x1340   :  { %v680_v62 = vsub.f32 1.0, %v679_v61 }
0x1342   :  { %v681_v0 = vmul.f32 %v808_v60, %v680_v62 }
0x1344   :  { %v682_v2 = vadd.f32 %v808_v60, %v681_v0 }
0x1346   :  { %v686_v4 = vsel %vm685_vm5, %v808_v60, %v682_v2 }
0x1347   :  { %v691_v5 = vsel %vm688_vm7, %v690_v3, %v686_v4 }
0x1348   :  { %694 = vst.msk [vmem:[%s945_s6] sm:$0xff] %vm693_vm6, %v691_v5 }

</bundles_post_ra>
